<compile_context>
chip_gen: v7x
topology: tpu7x:2x2x1
jax: 0.10.0
libtpu: 0.0.40
codegen_flags: <defaults>
</compile_context>

<pallas_src>
import jax
import jax.numpy as jnp
from jax.experimental import pallas as pl
from jax.experimental.pallas import tpu as pltpu


# --------------------------------------------------------------------------- #
# Kernel                                                                      #
# --------------------------------------------------------------------------- #
def _attention_kernel(l_ref, hd_ref, o_ref, lt_ref, soft_ref):
    # l_ref   : (bt, H, T)   untransposed lstm_output block (resident across t)
    # hd_ref  : (bt, H, H)   permuted last_state block      (resident across t)
    # o_ref   : (bt, tt, T)  output rows for this t-tile
    # lt_ref  : (bt, T, H)   scratch: hoisted L^T in MXU dtype
    # soft_ref: (bt, T, H)   scratch: softmax weights in MXU dtype
    t = pl.program_id(1)
    tt = o_ref.shape[1]
    mxu_dtype = lt_ref.dtype

    @pl.when(t == 0)
    def _():
        # Single hoisted transpose of L (one XLU pass per batch block, amortized
        # over both matmuls and all t-tiles), then cast MXU operands to bf16.
        lt = jnp.swapaxes(l_ref[...], 1, 2).astype(mxu_dtype)          # (bt, T, H)
        hd = hd_ref[...].astype(mxu_dtype)                             # (bt, H, H)
        lt_ref[...] = lt

        # attn[b, t, p] = sum_h lstm[b, h, t] * last_state[p, b, h]
        # bf16 operands, f32 accumulation on the MXU.
        attn = jnp.einsum("bth,bhp->btp", lt, hd,
                          preferred_element_type=jnp.float32)          # (bt, T, H)

        # softmax over dim=1 (the t axis); kept in f32 for stability.
        m = jnp.max(attn, axis=1, keepdims=True)                       # (bt, 1, H)
        e = jnp.exp(attn - m)                                          # (bt, T, H)
        s = jnp.sum(e, axis=1, keepdims=True)                          # (bt, 1, H)
        # Exact reciprocal: the denominator is only (bt, 1, H) elements, so the
        # approx EUP path buys nothing and exactness removes a drift source.
        soft = e * pl.reciprocal(s, approx=False)                      # (bt, T, H)
        soft_ref[...] = soft.astype(mxu_dtype)

    # out[b, t, q] = sum_h lstm[b, h, t] * soft[b, q, h], for this t-tile of rows.
    row0 = pl.multiple_of(t * tt, tt)
    lt_tile = lt_ref[:, pl.ds(row0, tt), :]                            # (bt, tt, H)
    out = jnp.einsum("bth,bqh->btq", lt_tile, soft_ref[...],
                     preferred_element_type=jnp.float32)               # (bt, tt, T)
    o_ref[...] = out.astype(o_ref.dtype)


# --------------------------------------------------------------------------- #
# Tiling policy (generation-aware VMEM / grid policy)                         #
# --------------------------------------------------------------------------- #
def _mxu_dtype(dtype):
    # All three generations' MXUs are bf16-native; f32 operands take a slower
    # multi-pass emulated path. f32/bf16 inputs are fed to the MXU as bf16 with
    # f32 accumulation (documented precision tradeoff).
    if jnp.dtype(dtype) in (jnp.dtype(jnp.float32), jnp.dtype(jnp.bfloat16)):
        return jnp.bfloat16
    return dtype


def _tpu_vmem_bytes():
    """Per-TensorCore VMEM capacity; conservative 64 MiB (v7x-class) fallback."""
    try:
        info = pltpu.get_tpu_info()
        cap = getattr(info, "vmem_capacity_bytes", None)
        if cap:
            return int(cap)
    except Exception:
        pass
    return 64 * 1024 * 1024


def _block_vmem_bytes(bt, tt, H, T, in_itemsize, mxu_itemsize):
    """Working-set estimate for one grid step (corrected accounting)."""
    # Double-buffered pipeline blocks (two inputs + output), in the I/O dtype.
    pipeline = 2 * bt * (H * T + H * H + tt * T) * in_itemsize
    # Single-buffered persistent scratch: L^T and softmax weights (MXU dtype).
    scratch = 2 * bt * T * H * mxu_itemsize
    # Live temporaries (NOT double-buffered): f32 logits + exp, the cast hidden
    # block, and the f32 output tile before the final cast.
    live = bt * (2 * T * H * 4 + H * H * mxu_itemsize + tt * T * 4)
    return pipeline + scratch + live


def _choose_tiling(B, H, T, in_itemsize, mxu_itemsize):
    MIB = 1024 * 1024
    vmem = _tpu_vmem_bytes()
    if vmem >= 100 * MIB:
        # v5e / v6e class: one TensorCore, 128 MiB VMEM -> big blocks, no grid
        # floor (a second core does not need feeding).
        budget, limit, min_batch_steps = 72 * MIB, 96 * MIB, 1
    else:
        # v7x class: 64 MiB VMEM, two TensorCores share the parallel batch axis.
        # Keep >= 4 batch steps when B allows so each core gets >= 2 steps and
        # the block DMA overlaps compute.
        budget, limit, min_batch_steps = 40 * MIB, 52 * MIB, min(4, B)

    def fits(bt, tt):
        return _block_vmem_bytes(bt, tt, H, T, in_itemsize, mxu_itemsize) <= budget

    # Largest batch tile (divisor of B) that fits with full-T output blocks.
    bt = 1
    for d in range(1, B + 1):
        if B % d == 0 and B // d >= min_batch_steps and fits(d, T):
            bt = d

    # Fallback for long sequences: tile the output rows (t axis).  tt must be a
    # multiple of 8 (sublane tile) or the full extent T.
    tt = T
    if not fits(bt, T):
        cands = [d for d in range(8, T + 1) if T % d == 0 and d % 8 == 0]
        fitting = [d for d in cands if fits(bt, d)]
        if fitting:
            tt = max(fitting)
        elif cands:
            tt = min(cands)   # best effort; vmem_limit still leaves headroom
        # else: T has no multiple-of-8 divisor -> keep the (legal) full extent.

    return bt, tt, limit


# --------------------------------------------------------------------------- #
# Wrapper                                                                     #
# --------------------------------------------------------------------------- #
def attention_forward(lstm_output, last_state):
    """lstm_output: (B, H, T); last_state: (H, B, H) -> (B, T, T) (squeeze(2) no-op for T > 1)."""
    B, H, T = lstm_output.shape
    assert last_state.shape == (H, B, H), "module requires last_state of shape (H, B, H)"

    in_dtype = lstm_output.dtype
    mxu_dtype = _mxu_dtype(in_dtype)
    in_itemsize = jnp.dtype(in_dtype).itemsize
    mxu_itemsize = jnp.dtype(mxu_dtype).itemsize

    # Only the tiny last_state permute stays in the wrapper; the big lstm_output
    # transpose is done once per block inside the kernel (no extra HBM pass).
    hd = jnp.transpose(last_state, (1, 2, 0))   # (B, H, H)

    bt, tt, vmem_limit = _choose_tiling(B, H, T, in_itemsize, mxu_itemsize)
    nb, nt = B // bt, T // tt

    flops = 2 * B * (T * H * H + T * T * H)
    bytes_accessed = (B * H * T + B * H * H + B * T * T) * in_itemsize
    transcendentals = B * T * H   # exp in the softmax

    out = pl.pallas_call(
        _attention_kernel,
        out_shape=jax.ShapeDtypeStruct((B, T, T), in_dtype),
        grid_spec=pltpu.PrefetchScalarGridSpec(
            num_scalar_prefetch=0,
            grid=(nb, nt),
            in_specs=[
                pl.BlockSpec((bt, H, T), lambda b, t: (b, 0, 0)),   # lstm_output (untransposed)
                pl.BlockSpec((bt, H, H), lambda b, t: (b, 0, 0)),   # permuted last_state
            ],
            out_specs=pl.BlockSpec((bt, tt, T), lambda b, t: (b, t, 0)),
            scratch_shapes=[
                pltpu.VMEM((bt, T, H), mxu_dtype),   # hoisted L^T
                pltpu.VMEM((bt, T, H), mxu_dtype),   # softmax weights
            ],
        ),
        compiler_params=pltpu.CompilerParams(
            dimension_semantics=("parallel", "arbitrary"),
            vmem_limit_bytes=vmem_limit,
        ),
        cost_estimate=pl.CostEstimate(
            flops=flops,
            transcendentals=transcendentals,
            bytes_accessed=bytes_accessed,
        ),
    )(lstm_output, hd)

    # torch .squeeze(2): only removes the dim if it is size 1.
    if out.shape[2] == 1:
        out = jnp.squeeze(out, axis=2)
    return out


# --------------------------------------------------------------------------- #
# References for verification                                                 #
# --------------------------------------------------------------------------- #
def _reference_f32(lstm_output, last_state):
    """Pure-f32 mirror of the PyTorch code (highest matmul precision)."""
    hidden = jnp.transpose(last_state, (1, 2, 0)).astype(jnp.float32)   # (B, H, H)
    L = jnp.transpose(lstm_output, (0, 2, 1)).astype(jnp.float32)       # (B, T, H)
    attn = jnp.einsum("bth,bhp->btp", L, hidden,
                      precision=jax.lax.Precision.HIGHEST)
    soft = jax.nn.softmax(attn, axis=1)
    out = jnp.einsum("bth,bph->btp", L, soft,
                     precision=jax.lax.Precision.HIGHEST)
    if out.shape[2] == 1:
        out = jnp.squeeze(out, axis=2)
    return out


def _reference_mxu(lstm_output, last_state):
    """Mirror of the PyTorch code at the kernel's operand precision
    (bf16 MXU operands, f32 accumulation, f32 softmax)."""
    mxu = _mxu_dtype(lstm_output.dtype)
    hidden = jnp.transpose(last_state, (1, 2, 0)).astype(mxu)
    L = jnp.transpose(lstm_output, (0, 2, 1)).astype(mxu)
    attn = jnp.einsum("bth,bhp->btp", L, hidden, preferred_element_type=jnp.float32)
    soft = jax.nn.softmax(attn, axis=1)
    out = jnp.einsum("bth,bph->btp", L, soft.astype(mxu),
                     preferred_element_type=jnp.float32)
    out = out.astype(lstm_output.dtype)
    if out.shape[2] == 1:
        out = jnp.squeeze(out, axis=2)
    return out


# --------------------------------------------------------------------------- #
# Test                                                                        #
# --------------------------------------------------------------------------- #
if __name__ == "__main__":
    B, H, T = 2, 32, 8   # batch=2, hidden=32, seq=8
    key = jax.random.PRNGKey(0)
    k1, k2 = jax.random.split(key)
    lstm_output = jax.random.normal(k1, (B, H, T), dtype=jnp.float32)
    last_state = jax.random.normal(k2, (H, B, H), dtype=jnp.float32)

    out = attention_forward(lstm_output, last_state)
    out = jax.block_until_ready(out)

    ref_f32 = _reference_f32(lstm_output, last_state)
    ref_mxu = _reference_mxu(lstm_output, last_state)
    assert out.shape == ref_f32.shape == (B, T, T)

    # Tight check vs. a reference computed with the same (documented) precision
    # policy: bf16 MXU operands, f32 accumulation, f32 softmax.  Remaining
    # differences are only accumulation order -> f32 roundoff.
    assert jnp.allclose(out, ref_mxu, atol=2e-3, rtol=2e-3), \
        "mismatch vs precision-matched reference"

    # Coarse sanity bound vs. the pure-f32 reference: bf16 operand rounding of
    # the logits is amplified by exp() into percent-level softmax-weight shifts
    # near logit ties, so a per-element 1e-3 tolerance is not meaningful here;
    # the relative Frobenius error is the right metric for the deliberate bf16
    # MXU feed (expected well under 1%).
    rel = jnp.linalg.norm((out - ref_f32).astype(jnp.float32)) / (
        jnp.linalg.norm(ref_f32.astype(jnp.float32)) + 1e-6)
    assert float(rel) < 5e-2, f"bf16-MXU vs f32 reference relative error too large: {float(rel)}"

    print("KERNEL_OK")
</pallas_src>

<mosaic_0001>
module attributes {stable_mosaic.version = 11 : i64} {
  func.func @_attention_kernel(%arg0: i32, %arg1: i32, %arg2: memref<1x32x8xf32, #tpu.memory_space<vmem>>, %arg3: memref<1x32x32xf32, #tpu.memory_space<vmem>>, %arg4: memref<1x8x8xf32, #tpu.memory_space<vmem>>, %arg5: memref<1x8x32xbf16, #tpu.memory_space<vmem>>, %arg6: memref<1x8x32xbf16, #tpu.memory_space<vmem>>) attributes {dimension_semantics = [#tpu.dimension_semantics<parallel>, #tpu.dimension_semantics<arbitrary>], iteration_bounds = array<i64: 2, 1>, scalar_prefetch = 0 : i64, scratch_operands = 2 : i64, tpu.core_type = #tpu.core_type<tc>, window_params = [{transform_indices = @transform_0, window_bounds = array<i64: 1, 32, 8>}, {transform_indices = @transform_1, window_bounds = array<i64: 1, 32, 32>}, {transform_indices = @transform_2, window_bounds = array<i64: 1, 8, 8>}]} {
    %c0_i32 = arith.constant 0 : i32
    %0 = arith.cmpi eq, %arg1, %c0_i32 : i32
    %1 = arith.extui %0 : i1 to i32
    %c0_i32_0 = arith.constant 0 : i32
    %2 = arith.cmpi ne, %1, %c0_i32_0 : i32
    scf.if %2 {
      %c0_8 = arith.constant 0 : index
      %c0_9 = arith.constant 0 : index
      %c0_10 = arith.constant 0 : index
      %10 = vector.load %arg2[%c0_8, %c0_9, %c0_10] : memref<1x32x8xf32, #tpu.memory_space<vmem>>, vector<1x32x8xf32>
      %11 = tpu.transpose %10, [0, 2, 1] : vector<1x32x8xf32> -> vector<1x8x32xf32>
      %12 = arith.truncf %11 : vector<1x8x32xf32> to vector<1x8x32xbf16>
      %c0_11 = arith.constant 0 : index
      %c0_12 = arith.constant 0 : index
      %c0_13 = arith.constant 0 : index
      %13 = vector.load %arg3[%c0_11, %c0_12, %c0_13] : memref<1x32x32xf32, #tpu.memory_space<vmem>>, vector<1x32x32xf32>
      %14 = arith.truncf %13 : vector<1x32x32xf32> to vector<1x32x32xbf16>
      %c0_14 = arith.constant 0 : index
      %c0_15 = arith.constant 0 : index
      %c0_16 = arith.constant 0 : index
      %15 = vector.load %arg5[%c0_14, %c0_15, %c0_16] : memref<1x8x32xbf16, #tpu.memory_space<vmem>>, vector<1x8x32xbf16>
      tpu.vector_store %arg5[%c0_14, %c0_15, %c0_16], %12 {strides = array<i32>} : memref<1x8x32xbf16, #tpu.memory_space<vmem>>, vector<1x8x32xbf16>,
      "tpu.trace_start"() <{level = 10 : i32, message = "bth,bhp->btp"}> : () -> ()
      %cst_17 = arith.constant dense<0.000000e+00> : vector<1x8x32xf32>
      %16 = tpu.matmul %12, %14, %cst_17 {dimension_numbers = #tpu.dot_dimension_numbers<[2], [1], [1], [2], [0, 0, 0, 1, 1, 2], [0], [0]>} : vector<1x8x32xbf16>, vector<1x32x32xbf16>, vector<1x8x32xf32> -> vector<1x8x32xf32>
      "tpu.trace_stop"() : () -> ()
      %cst_18 = arith.constant dense<0xFF800000> : vector<1x32xf32>
      %17 = vector.multi_reduction <maximumf>, %16, %cst_18 [1] : vector<1x8x32xf32> to vector<1x32xf32>
      %18 = vector.shape_cast %17 : vector<1x32xf32> to vector<1x1x32xf32>
      %19 = vector.broadcast %18 : vector<1x1x32xf32> to vector<1x8x32xf32>
      %20 = arith.subf %16, %19 : vector<1x8x32xf32>
      %21 = math.exp %20 : vector<1x8x32xf32>
      %cst_19 = arith.constant dense<0.000000e+00> : vector<1x32xf32>
      %22 = vector.multi_reduction <add>, %21, %cst_19 [1] : vector<1x8x32xf32> to vector<1x32xf32>
      %23 = vector.shape_cast %22 : vector<1x32xf32> to vector<1x1x32xf32>
      %24 = tpu.reciprocal %23 : vector<1x1x32xf32> -> vector<1x1x32xf32>
      %25 = vector.broadcast %24 : vector<1x1x32xf32> to vector<1x8x32xf32>
      %26 = arith.mulf %21, %25 : vector<1x8x32xf32>
      %27 = arith.truncf %26 : vector<1x8x32xf32> to vector<1x8x32xbf16>
      %c0_20 = arith.constant 0 : index
      %c0_21 = arith.constant 0 : index
      %c0_22 = arith.constant 0 : index
      %28 = vector.load %arg6[%c0_20, %c0_21, %c0_22] : memref<1x8x32xbf16, #tpu.memory_space<vmem>>, vector<1x8x32xbf16>
      tpu.vector_store %arg6[%c0_20, %c0_21, %c0_22], %27 {strides = array<i32>} : memref<1x8x32xbf16, #tpu.memory_space<vmem>>, vector<1x8x32xbf16>,
    } else {
    }
    %c8_i32 = arith.constant 8 : i32
    %3 = arith.muli %arg1, %c8_i32 : i32
    %4 = tpu.assume_multiple %3, 8 : i32
    %c0 = arith.constant 0 : index
    %5 = arith.index_cast %4 : i32 to index
    %c0_1 = arith.constant 0 : index
    %6 = vector.load %arg5[%c0, %5, %c0_1] : memref<1x8x32xbf16, #tpu.memory_space<vmem>>, vector<1x8x32xbf16>
    %c0_2 = arith.constant 0 : index
    %c0_3 = arith.constant 0 : index
    %c0_4 = arith.constant 0 : index
    %7 = vector.load %arg6[%c0_2, %c0_3, %c0_4] : memref<1x8x32xbf16, #tpu.memory_space<vmem>>, vector<1x8x32xbf16>
    "tpu.trace_start"() <{level = 10 : i32, message = "bth,bqh->btq"}> : () -> ()
    %cst = arith.constant dense<0.000000e+00> : vector<1x8x8xf32>
    %8 = tpu.matmul %6, %7, %cst {dimension_numbers = #tpu.dot_dimension_numbers<[2], [2], [1], [1], [0, 0, 0, 1, 1, 1], [0], [0]>} : vector<1x8x32xbf16>, vector<1x8x32xbf16>, vector<1x8x8xf32> -> vector<1x8x8xf32>
    "tpu.trace_stop"() : () -> ()
    %c0_5 = arith.constant 0 : index
    %c0_6 = arith.constant 0 : index
    %c0_7 = arith.constant 0 : index
    %9 = vector.load %arg4[%c0_5, %c0_6, %c0_7] : memref<1x8x8xf32, #tpu.memory_space<vmem>>, vector<1x8x8xf32>
    tpu.vector_store %arg4[%c0_5, %c0_6, %c0_7], %8 {strides = array<i32>} : memref<1x8x8xf32, #tpu.memory_space<vmem>>, vector<1x8x8xf32>,
    return
  }
  func.func @transform_0(%arg0: i32, %arg1: i32) -> (i32, i32, i32) {
    %c0_i32 = arith.constant 0 : i32
    %c0_i32_0 = arith.constant 0 : i32
    %c0_i32_1 = arith.constant 0 : i32
    return %arg0, %c0_i32, %c0_i32_0 : i32, i32, i32
  }
  func.func @transform_1(%arg0: i32, %arg1: i32) -> (i32, i32, i32) {
    %c0_i32 = arith.constant 0 : i32
    %c0_i32_0 = arith.constant 0 : i32
    %c0_i32_1 = arith.constant 0 : i32
    return %arg0, %c0_i32, %c0_i32_0 : i32, i32, i32
  }
  func.func @transform_2(%arg0: i32, %arg1: i32) -> (i32, i32, i32) {
    %c0_i32 = arith.constant 0 : i32
    %c0_i32_0 = arith.constant 0 : i32
    return %arg0, %arg1, %c0_i32 : i32, i32, i32
  }
}

</mosaic_0001>

<bundles_post_ra>
// kernel: tpu_custom_call.1
= control target key start
LH: loop header
LB: loop body
LE: loop exit
PB: predicated region body
PF: predicated region fallthrough
CT: control target
= control target key end

     0   :  { %7 = vsyncpa [#allocation5], 0  ;;  %s762_s0 = inlined_call_operand.vmem [shape: f32[2,32,8], index: 0, kind: input, shape index: {}]   ;;  %s763_s1 = inlined_call_operand.vmem [shape: f32[2,32,32], index: 1, kind: input, shape index: {}]   ;;  %s764_s2 = inlined_call_operand.hbm [shape: f32[2,8,8], index: 2, kind: output, shape index: {}]  }
   0x1   :  { %9 = vsyncpa [#allocation5 + $0x1], 0  ;;  %s640_s9 = smov 0   ;;  %s642_s10 = smov 0  }
   0x2   :  { %s644_s11 = smov 0   ;;  %s646_s12 = smov 0  }
   0x3   :  { %s648_s13 = smov 0   ;;  %s650_s14 = smov 0  }
   0x4 LB: > { %s444_s15 = sadd.s32 4294967295, %s620_s14   ;;  %s445_s16 = sadd.s32 4294967294, %s620_s14   ;;  %s620_s14 = sphi %s650_s14, %s15_s14   ;;  %s616_s13 = sphi %s648_s13, %s771_s13   ;;  %s612_s12 = sphi %s646_s12, %s770_s12   ;;  %s608_s11 = sphi %s644_s11, %s769_s11   ;;  %s604_s10 = sphi %s642_s10, %s768_s10   ;;  %s600_s9 = sphi %s640_s9, %s767_s9  }
   0x5   : > { %s27_s17 = sadd.s32 1, %s616_s13  ;;  %s88_s18 = sadd.s32 1, %s608_s11 }
   0x6   : > { %p29_p0 = scmp.ge.s32.totalorder %s27_s17, 2  ;;  %p98_p1 = scmp.ne.s32.totalorder %s608_s11, %s604_s10 }
   0x7   : > { %p99_p2 = scmp.eq.s32.totalorder %s444_s15, 1  ;;  %p104_p3 = scmp.ne.s32.totalorder %s604_s10, %s600_s9 }
   0x8   : > { %s773_s17 = smov (%p29_p0, %s27_s17), 0  ;;  %p105_p5 = scmp.eq.s32.totalorder %s445_s16, 1 }
   0x9   : > { %p680_p4 = por %p99_p2, %p98_p1  ;;  %s83_s20 = ssub.s32 %s616_s13, %s773_s17 }
   0xa   : > { %p448_p6 = scmp.ge.s32.totalorder %s620_s14, 1  ;;  %p86_p7 = scmp.eq.s32.totalorder %s83_s20, 0 }
   0xb   : > { %p687_p8 = por %p105_p5, %p104_p3  ;;  %p139_p9 = scmp.lt.s32.totalorder %s620_s14, 3 }
   0xc   : > { %s693_s22 = scalar_select %p86_p7, %s608_s11, %s88_s18  }
   0xd   : > { %p140_p10 = pnand %p448_p6, %p139_p9 }
   0xe   : > { %p166_p11 = scmp.lt.s32.totalorder (!%p140_p10), %s612_s12, 1  ;;  %v622_v0 = vmov (!%p140_p10), 0.0   ;;  %vm623_vm0 = vmmov (!%p140_p10), 0   ;;  %vm224_vm1 = vcmask (!%p140_p10), 257024   ;;  %vm226_vm2 = vcmask (!%p140_p10), 261120   ;;  %s163_s3 = sand.u32 (!%p140_p10), 1, %s604_s10  }
   0xf   : > { %143 = sbr.rel (%p140_p10) target bundleno = 669 (0x29d), region = 28  ;;  %467 = vmatprep.subr.bf16.mxu0 (!%p140_p10), %v622_v0  ;;  %475 = vmatprep.subr.bf16.mxu1 (!%p140_p10), %v622_v0  ;;  %s449_s4 = sshll.u32 (!%p140_p10), %s163_s3, 3  ;;  %vm345_vm3 = vcmask (!%p140_p10), 64512  }
  0x10   : > { %471 = vmatprep.mubr.msk.bf16.mxu0 (!%p140_p10), %vm623_vm0, %v622_v0  ;;  %477 = vmatprep.mubr.msk.bf16.mxu1 (!%p140_p10), %vm623_vm0, %v622_v0  ;;  %s457_s5 = sshll.u32 (!%p140_p10), %s612_s12, 7  ;;  %s165_s6 = scalar_lea.vmem (!%p140_p10), [#allocation4], %s449_s4 }
  0x11   : > { %s362_s7 = sshll.u32 (!%p140_p10), %s165_s6, 4  ;;  %s715_s16 = scalar_lea.hbm (!%p140_p10), %s764_s2, %s457_s5  ;;  %s717_s7 = int_to_ptr.vmem [resolvable:$true] %s362_s7 }
  0x12   : > { %s348_s18 = scalar_lea.sflag (!%p140_p10), [#allocation5], %s163_s3  ;;  %s542_s20 = scalar_lea.vmem (!%p140_p10), %s717_s7, 128 }
  0x13   : > { %p543_p12 = scmp.ne.s32.totalorder (!%p140_p10), %s717_s7, %s542_s20 }
  0x15   : > { %p544_p13 = pnand (!%p140_p10), %p543_p12, %p680_p4 }
  0x16   : > { %s167_s23 = scalar_select %p166_p11, %s612_s12, 1 }
  0x17   : > { %p545_p0 = pneg %p544_p13  ;;  %s624_s12 = smov [#allocation4]  }
  0x18   : > { %s460_s24 = sshll.u32 %s167_s23, 5  ;;  %s546_s23 = sshll.u32 %s624_s12, 4  ;;  %s547_s23 = int_to_ptr.vmem [resolvable:$false] %s546_s23 }
  0x19   : > { %s170_s27 = scalar_lea.vmem %s762_s0, %s460_s24  ;;  %s175_s30 = scalar_lea.vmem %s763_s1, %s460_s24 }
  0x1a   : > { %v181_v1 = vld [vmem:[%s170_s27] sm:$0xff]  ;;  %v219_v3 = vld [vmem:[%s175_s30 + $0x8] sm:$0xff]  ;;  %v220_v6 = vld [vmem:[%s175_s30 + $0x10] sm:$0xff]  ;;  %s548_s24 = scalar_lea.vmem %s547_s23, 256  ;;  %p549_p1 = scmp.lt.s32.totalorder %s717_s7, %s547_s23 }
  0x1b   : > { %185 = vxpose.xlu0.b32.start [1/4] (short) (narrow) %v181_v1, 8  ;;  %v218_v2 = vld [vmem:[%s175_s30] sm:$0xff]  ;;  %v182_v4 = vld [vmem:[%s170_s27 + $0x8] sm:$0xff]  ;;  %v221_v7 = vld [vmem:[%s175_s30 + $0x18] sm:$0xff]  ;;  %p550_p2 = scmp.lt.s32.totalorder %s548_s24, %s542_s20 }
  0x1c   : > { %v222_v5 = vpack.c.bf16 %v219_v3, %v218_v2  ;;  %v223_v8 = vpack.c.bf16 %v221_v7, %v220_v6  ;;  %v183_v9 = vld [vmem:[%s170_s27 + $0x10] sm:$0xff]  ;;  %v184_v10 = vld [vmem:[%s170_s27 + $0x18] sm:$0xff] }
  0x1d   : > { %p551_p3 = por %p550_p2, %p549_p1 }
  0x1e   : > { %468 = vmatpush3.bf16.msra.mxu0 %v222_v5 }
  0x1f   : > { %186 = vxpose.xlu0.b32.cont [2/4] (short) (narrow) %v182_v4, 8  ;;  %469 = vmatprep.subr.bf16.mxu0 %v622_v0  ;;  %p552_p5 = pnand %p551_p3, %p545_p0 }
  0x22   : > { %470 = vmatpush3.bf16.msra.mxu0 %v223_v8 }
  0x23   : > { %187 = vxpose.xlu0.b32.cont [3/4] (short) (narrow) %v183_v9, 8 }
  0x27   : > { %188 = vxpose.xlu0.b32.end [4/4] (short) (narrow) %v184_v10, 8 }
  0x9b   : > { %v201_v11 = vpop.trf.xlu0 }
  0x9c   : > { %v217_v12 = vpack.c.bf16 %v201_v11, %v201_v11 }
  0x9e   : > { %225 = vst.msk [vmem:[#allocation2] sm:$0xf] %vm224_vm1, %v217_v12  ;;  %472 = vmatmul.mubr.msk.bf16.vlgmr.msra.gmra.mrb[0].mxu0 %vm226_vm2, %v217_v12 }
  0xa5   : > { %v296_v39 = vld [vmem:[#allocation2] sm:$0xf] }
 0x171   : > { %v264_v13 = vpop.f32.mrb[0].mxu0 }
 0x172   : > { %v270_v14 = vsel %vm226_vm2, %v264_v13, -inf  ;;  %v473_v15 = vpop.f32.mrb[1].mxu0 }
 0x173   : > { %v271_v16 = vrot.slane %v270_v14, 4  ;;  %v267_v17 = vpop.f32.mrb[2].mxu0 }
 0x174   : > { %v474_v18 = vpop.f32.mrb[3].mxu0 }
 0x175   : > { %v272_v19 = vmax.f32 %v270_v14, %v271_v16 }
 0x177   : > { %v273_v20 = vrot.slane %v272_v19, 2 }
 0x179   : > { %v274_v21 = vmax.f32 %v272_v19, %v273_v20 }
 0x17b   : > { %v275_v22 = vrot.slane %v274_v21, 1 }
 0x17d   : > { %v276_v23 = vmax.f32 %v274_v21, %v275_v22 }
 0x17f   : > { %v277_v24 = vsub.f32 %v264_v13, %v276_v23 }
 0x181   : > { %v278_v25 = vmul.f32 1.442695, %v277_v24 }
 0x183   : > { %538 = vpow2.f32 %v278_v25 }
 0x18d   : > { %v539_v26 = vpop.eup %538 }
 0x18e   : > { %v280_v27 = vsel %vm226_vm2, %v539_v26, 0.0 }
 0x18f   : > { %v281_v28 = vrot.slane %v280_v27, 4 }
 0x191   : > { %v282_v29 = vadd.f32 %v281_v28, %v280_v27 }
 0x193   : > { %v283_v30 = vrot.slane %v282_v29, 2 }
 0x195   : > { %v284_v31 = vadd.f32 %v283_v30, %v282_v29 }
 0x197   : > { %v285_v32 = vrot.slane %v284_v31, 1 }
 0x199   : > { %v286_v33 = vadd.f32 %v285_v32, %v284_v31 }
 0x19b   : > { %540 = vrcp.f32 %v286_v33 }
 0x1a5   : > { %v541_v34 = vpop.eup %540 }
 0x1a6   : > { %v288_v35 = vmul.f32 %v541_v34, %v539_v26 }
 0x1a8   : > { %v289_v36 = vpack.c.bf16 %v288_v35, %v288_v35 }
 0x1aa   : > { %290 = vst.msk [vmem:[#allocation3] sm:$0xf] %vm224_vm1, %v289_v36 }
 0x1b1   : > { %v297_v37 = vld [vmem:[#allocation3] sm:$0xf] }
 0x1b2   : > { %v303_v38 = vsel %vm226_vm2, %v297_v37, 0 }
 0x1b3   : > { %476 = vmatpush3.bf16.xpose.msra.mxu1 %v303_v38 }
 0x1ba   : > { %478 = vmatmul.mubr.msk.bf16.vlgmr.msra.gmra.mrb[0].mxu1 %vm226_vm2, %v296_v39 }
 0x28d   : > { %v339_v40 = vpop.f32.mrb[0].mxu1 }
 0x28e   : > { %346 = vst.msk [vmem:[%s165_s6] sm:$0xff] %vm345_vm3, %v339_v40  ;;  %v479_v41 = vpop.f32.mrb[1].mxu1 }
 0x28f   : > { %v342_v42 = vpop.f32.mrb[2].mxu1 }
 0x290   : > { %555 = shalt.err (!%p552_p5)
}
 0x291   : > { %s556_s25 = scalar_lea.hbm %s715_s16, 128  ;;  %s560_s28 = scalar_lea.hbm %s764_s2, 256 }
 0x292   : > { %p557_p6 = scmp.ne.s32.totalorder %s715_s16, %s556_s25  ;;  %p561_p10 = scmp.lt.u32.totalorder %s715_s16, %s764_s2 }
 0x293   : > { %p562_p11 = scmp.lt.u32.totalorder %s560_s28, %s556_s25  ;;  %p564_p13 = scmp.lt.u32.totalorder %s556_s25, %s715_s16 }
 0x294   : > { %p558_p7 = pnand %p557_p6, %p680_p4 }
 0x295   : > { %p563_p12 = por %p562_p11, %p561_p10 }
 0x296   : > { %p559_p9 = pneg %p558_p7 }
 0x297   : > { %p565_p0 = por %p564_p13, %p563_p12 }
 0x299   : > { %p566_p1 = pnand %p565_p0, %p559_p9 }
 0x29b   : > { %569 = shalt.err (!%p566_p1)
}
 0x29c   : > { %481 = dma.vmem_to_hbm [thread:$0]  (%p680_p4), %s717_s7, 128, %s715_s16, %s348_s18   ;;  %v480_v43 = vpop.f32.mrb[3].mxu1 }
 0x29d PF: > { %p487_p2 = scmp.ge.s32.totalorder %s620_s14, 2  ;;  %s374_s3 = sand.u32 1, %s600_s9  }
 0x29e   : > { %s375_s4 = scalar_lea.sflag [#allocation5], %s374_s3 }
 0x29f   : > { %p484_p3 = pnand %p487_p2, %p687_p8 }
 0x2a1   : > { %595 = dma.done.wait (!%p484_p3), %s375_s4, 128  }
 0x2a2   : > { %597 = vsyncadd (!%p484_p3), %s375_s4, 4294967168  ;;  %s15_s14 = sadd.s32 1, %s620_s14   ;;  %s767_s9 = smov %s604_s10 }
 0x2a3   : > { %p12_p5 = scmp.ge.s32.totalorder %s15_s14, 4   ;;  %s768_s10 = smov %s608_s11 }
 0x2a4   : > { %s769_s11 = smov %s693_s22  ;;  %s770_s12 = smov %s616_s13 }
 0x2a5   : > { %s771_s13 = smov %s773_s17  ;;  %14 = sbr.rel (!%p12_p5) target bundleno = 4 (0x4), region = 71 }
 0x2ac   :  { %380 = vsyncpa [#allocation5], 1 }
 0x2ad   :  { %382 = vsyncpa [#allocation5 + $0x1], 1 }

</bundles_post_ra>
